<compile_context>
chip_gen: v6e
topology: v6e:2x2x1
jax: 0.10.0
libtpu: 0.0.40
codegen_flags: <defaults>
</compile_context>

<pallas_src>
import functools

import jax
import jax.numpy as jnp
from jax.experimental import pallas as pl
from jax.experimental.pallas import tpu as pltpu


def _gaussian_kernel(x_ref, o_ref, *, mu, c):
    # Compute in f32 regardless of storage dtype: the kernel is HBM-bound with
    # large VPU/EUP slack, so the casts are free; improves bf16 accuracy and
    # matches v5e (which has no bf16 VPU/EUP and upcasts anyway).
    x = x_ref[...].astype(jnp.float32)
    d = x - mu
    o_ref[...] = jnp.exp(c * (d * d)).astype(o_ref.dtype)


def _round_up(a, b):
    return -(-a // b) * b


def gaussian_activation(x, mu=0.0, sigma=1.0, *, target_block_bytes=4 << 20):
    """Elementwise Gaussian activation via a Pallas TPU kernel.

    Accepts any shape (e.g. NCHW).  Collapses only the leading dims to a
    (rows, C) view (layout-preserving: minor dim untouched), runs a 1-D ragged
    grid of byte-sized blocks over the rows, and reshapes back.  No padding.
    """
    orig_shape = x.shape
    orig_dtype = x.dtype
    n = x.size
    if n == 0:
        return x

    # Collapse ONLY leading dims; the minor dim (and its HBM tiling) is kept.
    C = int(orig_shape[-1]) if x.ndim >= 2 else int(n)
    rows = n // C
    x2d = jnp.reshape(x, (rows, C))

    itemsize = jnp.dtype(orig_dtype).itemsize
    # Sublane granularity per dtype (f32: 8, bf16/f16: 16, int8/fp8: 32).
    sub = max(8, 32 // max(1, itemsize))
    lane = 128

    # VMEM footprint of one row is lane-padded to a multiple of 128.
    row_bytes_vmem = _round_up(C, lane) * itemsize

    if rows <= sub:
        # Full-extent block along rows is always a legal block shape.
        eff_tile = rows
    else:
        # Byte-sized tiles: every dtype gets ~target_block_bytes per block.
        tile_rows = max(sub, target_block_bytes // row_bytes_vmem)
        # Balanced, even block count so the two v7x TensorCores split the work
        # evenly and the last (masked) block isn't disproportionately ragged.
        pairs = max(1, -(-rows // (2 * tile_rows)))
        eff_tile = -(-rows // (2 * pairs))
        eff_tile = min(_round_up(eff_tile, sub), rows)

    grid = (pl.cdiv(rows, eff_tile),)

    # in + out, double-buffered, plus headroom; never below what the block
    # actually needs.  Default target (4 MiB) -> ~18 MiB: fits every gen.
    block_bytes = eff_tile * row_bytes_vmem
    vmem_limit = int(max(4 * block_bytes + (2 << 20), 16 << 20))

    mu_f = float(mu)
    sigma_f = float(sigma)
    # sigma == 0 matches torch semantics (inf scale -> exp gives 0/NaN) rather
    # than raising a Python ZeroDivisionError at trace time.
    c = -0.5 / (sigma_f * sigma_f) if sigma_f != 0.0 else float("-inf")

    kernel = functools.partial(_gaussian_kernel, mu=mu_f, c=c)

    out2d = pl.pallas_call(
        kernel,
        out_shape=jax.ShapeDtypeStruct((rows, C), orig_dtype),
        grid_spec=pltpu.PrefetchScalarGridSpec(
            num_scalar_prefetch=0,
            grid=grid,
            in_specs=[pl.BlockSpec((eff_tile, C), lambda i: (i, 0))],
            out_specs=pl.BlockSpec((eff_tile, C), lambda i: (i, 0)),
        ),
        compiler_params=pltpu.CompilerParams(
            dimension_semantics=("parallel",),
            vmem_limit_bytes=vmem_limit,
        ),
        cost_estimate=pl.CostEstimate(
            flops=3 * n,            # sub, mul, mul per element
            transcendentals=n,      # one exp per element
            bytes_accessed=2 * n * itemsize,
        ),
    )(x2d)

    # Leading-dim expansion back to the original shape (layout-preserving).
    return jnp.reshape(out2d, orig_shape)


def gaussian_activation_ref(x, mu=0.0, sigma=1.0):
    return jnp.exp(-0.5 * ((x - mu) / sigma) ** 2)


if __name__ == "__main__":
    key = jax.random.PRNGKey(0)

    # Primary test: NCHW f32 (matches the PyTorch module's typical input).
    x = jax.random.normal(key, (2, 4, 16, 16), dtype=jnp.float32)
    y = gaussian_activation(x, mu=0.0, sigma=1.0)
    jax.block_until_ready(y)
    y_ref = gaussian_activation_ref(x, mu=0.0, sigma=1.0)
    assert y.shape == x.shape and y.dtype == x.dtype
    assert jnp.allclose(y, y_ref, atol=1e-6, rtol=1e-6)

    # Ragged minor dim + ragged last block, non-default mu/sigma.
    x2 = jax.random.normal(jax.random.PRNGKey(1), (3, 5, 7), dtype=jnp.float32)
    y2 = gaussian_activation(x2, mu=0.5, sigma=2.0)
    jax.block_until_ready(y2)
    assert jnp.allclose(y2, gaussian_activation_ref(x2, 0.5, 2.0),
                        atol=1e-6, rtol=1e-6)

    # Lane-dense multi-block path (grid of 2 blocks).
    x3 = jax.random.normal(jax.random.PRNGKey(2), (64, 128), dtype=jnp.float32)
    y3 = gaussian_activation(x3)
    jax.block_until_ready(y3)
    assert jnp.allclose(y3, gaussian_activation_ref(x3), atol=1e-6, rtol=1e-6)

    # bf16 end-to-end (bf16 HBM traffic, f32 internal compute).
    xb = x.astype(jnp.bfloat16)
    yb = gaussian_activation(xb)
    jax.block_until_ready(yb)
    assert yb.dtype == jnp.bfloat16
    assert jnp.allclose(yb.astype(jnp.float32),
                        gaussian_activation_ref(xb.astype(jnp.float32)),
                        atol=1e-2, rtol=1e-2)

    print("KERNEL_OK")
</pallas_src>

<mosaic_0001>
module attributes {stable_mosaic.version = 11 : i64} {
  func.func @_gaussian_kernel(%arg0: i32, %arg1: memref<64x16xf32, #tpu.memory_space<vmem>>, %arg2: memref<64x16xf32, #tpu.memory_space<vmem>>) attributes {dimension_semantics = [#tpu.dimension_semantics<parallel>], iteration_bounds = array<i64: 2>, scalar_prefetch = 0 : i64, scratch_operands = 0 : i64, tpu.core_type = #tpu.core_type<tc>, window_params = [{transform_indices = @transform_0, window_bounds = array<i64: 64, 16>}, {transform_indices = @transform_1, window_bounds = array<i64: 64, 16>}]} {
    %c0 = arith.constant 0 : index
    %c0_0 = arith.constant 0 : index
    %0 = vector.load %arg1[%c0, %c0_0] : memref<64x16xf32, #tpu.memory_space<vmem>>, vector<64x16xf32>
    %cst = arith.constant 0.000000e+00 : f32
    %1 = vector.broadcast %cst : f32 to vector<64x16xf32>
    %2 = arith.subf %0, %1 : vector<64x16xf32>
    %3 = arith.mulf %2, %2 : vector<64x16xf32>
    %cst_1 = arith.constant -5.000000e-01 : f32
    %4 = vector.broadcast %cst_1 : f32 to vector<64x16xf32>
    %5 = arith.mulf %4, %3 : vector<64x16xf32>
    %6 = math.exp %5 : vector<64x16xf32>
    %c0_2 = arith.constant 0 : index
    %c0_3 = arith.constant 0 : index
    %7 = vector.load %arg2[%c0_2, %c0_3] : memref<64x16xf32, #tpu.memory_space<vmem>>, vector<64x16xf32>
    tpu.vector_store %arg2[%c0_2, %c0_3], %6 {strides = array<i32>} : memref<64x16xf32, #tpu.memory_space<vmem>>, vector<64x16xf32>,
    return
  }
  func.func @transform_0(%arg0: i32) -> (i32, i32) {
    %c0_i32 = arith.constant 0 : i32
    %c0_i32_0 = arith.constant 0 : i32
    return %arg0, %c0_i32 : i32, i32
  }
  func.func @transform_1(%arg0: i32) -> (i32, i32) {
    %c0_i32 = arith.constant 0 : i32
    %c0_i32_0 = arith.constant 0 : i32
    return %arg0, %c0_i32 : i32, i32
  }
}

</mosaic_0001>

<bundles_post_ra>
// kernel: tpu_custom_call.1
= control target key start
LH: loop header
LB: loop body
LE: loop exit
PB: predicated region body
PF: predicated region fallthrough
CT: control target
= control target key end

     0   :  { %s278_s6 = smov 0   ;;  %s310_s0 = inlined_call_operand.vmem [shape: f32[128,16], index: 0, kind: input, shape index: {}]   ;;  %s311_s1 = inlined_call_operand.vmem [shape: f32[128,16], index: 1, kind: output, shape index: {}]  }
   0x1 LB: > { %s225_s7 = sadd.s32 4294967295, %s266_s6   ;;  %p229_p0 = scmp.ge.s32.totalorder %s266_s6, 1  ;;  %s266_s6 = sphi %s278_s6, %s11_s6  }
   0x2   : > { %p88_p1 = scmp.lt.s32.totalorder %s266_s6, 3 }
   0x4   : > { %p89_p2 = pnand %p229_p0, %p88_p1 }
   0x5   : > { %s230_s8 = sshll.u32 (!%p89_p2), %s225_s7, 3 }
   0x6   : > { %92 = sbr.rel (%p89_p2) target bundleno = 43 (0x2b), region = 24  ;;  %p109_p3 = scmp.lt.s32.totalorder (!%p89_p2), %s230_s8, 15 }
   0xb   : > { %s313_s8 = smov (!%p109_p3, %s230_s8), 15  ;;  %vm160_vm0 = vcmask 130048  }
   0xc   : > { %s231_s9 = sshll.u32 %s313_s8, 3 }
   0xd   : > { %s112_s12 = scalar_lea.vmem %s310_s0, %s231_s9  ;;  %s118_s15 = scalar_lea.vmem %s311_s1, %s231_s9 }
   0xe   : > { %v120_v0 = vld [vmem:[%s112_s12] sm:$0xff]  ;;  %v121_v1 = vld [vmem:[%s112_s12 + $0x8] sm:$0xff]  ;;  %v122_v2 = vld [vmem:[%s112_s12 + $0x10] sm:$0xff] }
   0xf   : > { %v128_v3 = vmul.f32 %v120_v0, %v120_v0  ;;  %v129_v4 = vmul.f32 %v121_v1, %v121_v1  ;;  %v130_v5 = vmul.f32 %v122_v2, %v122_v2  ;;  %v123_v6 = vld [vmem:[%s112_s12 + $0x18] sm:$0xff]  ;;  %v124_v7 = vld [vmem:[%s112_s12 + $0x20] sm:$0xff]  ;;  %v125_v8 = vld [vmem:[%s112_s12 + $0x28] sm:$0xff] }
  0x10   : > { %v131_v9 = vmul.f32 %v123_v6, %v123_v6  ;;  %v132_v10 = vmul.f32 %v124_v7, %v124_v7  ;;  %v133_v11 = vmul.f32 %v125_v8, %v125_v8  ;;  %v126_v12 = vld [vmem:[%s112_s12 + $0x30] sm:$0xff]  ;;  %v127_v13 = vld [vmem:[%s112_s12 + $0x38] sm:$0xff] }
  0x11   : > { %v136_v14 = vmul.f32 -0.5, %v128_v3  ;;  %v137_v15 = vmul.f32 -0.5, %v129_v4  ;;  %v138_v16 = vmul.f32 -0.5, %v130_v5  ;;  %v134_v17 = vmul.f32 %v126_v12, %v126_v12 }
  0x12   : > { %v139_v18 = vmul.f32 -0.5, %v131_v9  ;;  %v140_v19 = vmul.f32 -0.5, %v132_v10  ;;  %v141_v20 = vmul.f32 -0.5, %v133_v11  ;;  %v135_v21 = vmul.f32 %v127_v13, %v127_v13 }
  0x13   : > { %v144_v22 = vmul.f32 1.442695, %v136_v14  ;;  %v146_v23 = vmul.f32 1.442695, %v137_v15  ;;  %v148_v24 = vmul.f32 1.442695, %v138_v16 }
  0x14   : > { %v150_v25 = vmul.f32 1.442695, %v139_v18  ;;  %v152_v26 = vmul.f32 1.442695, %v140_v19  ;;  %v142_v27 = vmul.f32 -0.5, %v134_v17  ;;  %v143_v28 = vmul.f32 -0.5, %v135_v21 }
  0x15   : > { %244 = vpow2.f32 %v144_v22  ;;  %v154_v29 = vmul.f32 1.442695, %v141_v20 }
  0x16   : > { %246 = vpow2.f32 %v146_v23  ;;  %v156_v30 = vmul.f32 1.442695, %v142_v27  ;;  %v158_v31 = vmul.f32 1.442695, %v143_v28 }
  0x17   : > { %248 = vpow2.f32 %v148_v24 }
  0x18   : > { %250 = vpow2.f32 %v150_v25 }
  0x19   : > { %252 = vpow2.f32 %v152_v26 }
  0x1a   : > { %254 = vpow2.f32 %v154_v29 }
  0x1b   : > { %256 = vpow2.f32 %v156_v30 }
  0x1c   : > { %258 = vpow2.f32 %v158_v31 }
  0x22   : > { %v245_v32 = vpop.eup %244 }
  0x23   : > { %v247_v33 = vpop.eup %246  ;;  %161 = vst.msk [vmem:[%s118_s15] sm:$0xff] %vm160_vm0, %v245_v32 }
  0x24   : > { %v249_v34 = vpop.eup %248  ;;  %162 = vst.msk [vmem:[%s118_s15 + $0x8] sm:$0xff] %vm160_vm0, %v247_v33 }
  0x25   : > { %v251_v35 = vpop.eup %250  ;;  %163 = vst.msk [vmem:[%s118_s15 + $0x10] sm:$0xff] %vm160_vm0, %v249_v34 }
  0x26   : > { %v253_v36 = vpop.eup %252  ;;  %164 = vst.msk [vmem:[%s118_s15 + $0x18] sm:$0xff] %vm160_vm0, %v251_v35 }
  0x27   : > { %v255_v37 = vpop.eup %254  ;;  %165 = vst.msk [vmem:[%s118_s15 + $0x20] sm:$0xff] %vm160_vm0, %v253_v36 }
  0x28   : > { %v257_v38 = vpop.eup %256  ;;  %166 = vst.msk [vmem:[%s118_s15 + $0x28] sm:$0xff] %vm160_vm0, %v255_v37 }
  0x29   : > { %v259_v39 = vpop.eup %258  ;;  %167 = vst.msk [vmem:[%s118_s15 + $0x30] sm:$0xff] %vm160_vm0, %v257_v38 }
  0x2a   : > { %168 = vst.msk [vmem:[%s118_s15 + $0x38] sm:$0xff] %vm160_vm0, %v259_v39 }
  0x2b PF: > { %s11_s6 = sadd.s32 1, %s266_s6  }
  0x2c   : > { %p8_p4 = scmp.ge.s32.totalorder %s11_s6, 4  }
  0x2e   :  { %10 = sbr.rel (!%p8_p4) target bundleno = 1 (0x1), region = 54 }

</bundles_post_ra>
